<compile_context>
chip_gen: v5e
topology: v5e:2x2
jax: 0.10.0
libtpu: 0.0.40
codegen_flags: <defaults>
</compile_context>

<pallas_src>
import functools

import jax
import jax.numpy as jnp
from jax.experimental import pallas as pl
from jax.experimental.pallas import tpu as pltpu


IN_FEATURES = 512
HIDDEN = 128
OUT2 = 28

# Default batch tile (rows per grid step), multiple of 256.
#   f32 x tile   : 2 (dbl-buf) * 2048*512*4 B = 8   MiB
#   f32 out tile : 2 (dbl-buf) * 2048*128*4 B = 2   MiB
#   bf16 weights : 2 *           512*128*2 B = 0.25 MiB (resident, DMA'd once)
# Total ~10.3 MiB -> inside the scoped-VMEM default on v5e (16 MiB),
# v6e (32 MiB) and v7x (32 MiB).
DEFAULT_TB = 2048

_V5E_SCOPED_VMEM_DEFAULT = 16 * 1024 * 1024
_VMEM_CAP = 48 * 1024 * 1024  # keep headroom under v7x's 64 MiB physical VMEM


def _round_up(x, m):
    return ((x + m - 1) // m) * m


def _linear_kernel(x_ref, w_ref, b_ref, o_ref):
    # x_ref: (TB, 512) f32    w_ref: (512, 128) bf16 (VMEM-resident)
    # b_ref: (1, 128)  f32    o_ref: (TB, 128)  f32 (or bf16 via flag)
    x_bf16 = x_ref[...].astype(jnp.bfloat16)          # in-kernel cast (VPU, free)
    acc = jnp.dot(x_bf16, w_ref[...], preferred_element_type=jnp.float32)
    o_ref[...] = (acc + b_ref[...]).astype(o_ref.dtype)


@functools.partial(jax.jit, static_argnames=("tb", "out_dtype"))
def fc1_forward(x, w1t_bf16, b1_2d, *, tb=DEFAULT_TB, out_dtype=jnp.float32):
    """x: [B, 512] f32; w1t_bf16: [512, 128] bf16; b1_2d: [1, 128] f32."""
    B = x.shape[0]

    # Tile selection:
    #   * small B: a single lane/sublane-aligned tile (round up to 8 sublanes).
    #   * larger B: at least 2 grid steps (so v7x's two TensorCores both get
    #     work via the "parallel" dimension semantics), capped at `tb`, rounded
    #     to a multiple of 256 rows.
    if B <= 512:
        TB = _round_up(B, 8)
    else:
        TB = min(tb, _round_up(-(-B // 2), 256))
    grid = (pl.cdiv(B, TB),)

    out_itemsize = jnp.dtype(out_dtype).itemsize

    # Double-buffered VMEM budget; raise the scoped limit only if the default
    # (16 MiB on v5e) would be exceeded.  Cap well under v7x's 64 MiB physical.
    vmem_need = (2 * TB * IN_FEATURES * x.dtype.itemsize      # x tiles (f32)
                 + 2 * TB * HIDDEN * out_itemsize             # out tiles
                 + 2 * IN_FEATURES * HIDDEN * 2               # resident weights
                 + 2 * HIDDEN * 4)                            # resident bias
    vmem_limit = None
    if vmem_need > _V5E_SCOPED_VMEM_DEFAULT - 2 * 1024 * 1024:
        vmem_limit = min(int(vmem_need * 5 // 4), _VMEM_CAP)

    cost = pl.CostEstimate(
        flops=2 * B * IN_FEATURES * HIDDEN,
        transcendentals=0,
        bytes_accessed=(B * IN_FEATURES * x.dtype.itemsize    # read x once (f32)
                        + B * HIDDEN * out_itemsize           # write out
                        + IN_FEATURES * HIDDEN * 2            # read weights once
                        + HIDDEN * 4),                        # read bias once
    )

    return pl.pallas_call(
        _linear_kernel,
        out_shape=jax.ShapeDtypeStruct((B, HIDDEN), out_dtype),
        grid=grid,
        in_specs=[
            pl.BlockSpec((TB, IN_FEATURES), lambda i: (i, 0)),      # batch-tiled x (f32)
            pl.BlockSpec((IN_FEATURES, HIDDEN), lambda i: (0, 0)),  # resident weights
            pl.BlockSpec((1, HIDDEN), lambda i: (0, 0)),            # resident bias
        ],
        out_specs=pl.BlockSpec((TB, HIDDEN), lambda i: (i, 0)),
        compiler_params=pltpu.CompilerParams(
            dimension_semantics=("parallel",),
            vmem_limit_bytes=vmem_limit,
        ),
        cost_estimate=cost,
    )(x, w1t_bf16, b1_2d)


class PrototypeJAX:
    """JAX/Pallas port of the PyTorch Prototype module."""

    def __init__(self, key):
        k1, k2, k3 = jax.random.split(key, 3)
        # Deterministic init mimicking nn.Linear's uniform(-1/sqrt(fan_in), ...)
        bound1 = 1.0 / jnp.sqrt(jnp.float32(IN_FEATURES))
        bound2 = 1.0 / jnp.sqrt(jnp.float32(HIDDEN))
        self.fc1_w = jax.random.uniform(
            k1, (HIDDEN, IN_FEATURES), jnp.float32, -bound1, bound1)
        self.fc1_b = jax.random.uniform(
            k2, (HIDDEN,), jnp.float32, -bound1, bound1)
        self.fc2_w = jax.random.uniform(
            k3, (OUT2, HIDDEN), jnp.float32, -bound2, bound2)

        # Kernel-layout operands computed ONCE (transpose + bf16 cast are not
        # on the per-call path).
        self._w1t_bf16 = self.fc1_w.T.astype(jnp.bfloat16)   # (512, 128)
        self._b1_2d = self.fc1_b.reshape(1, HIDDEN)          # (1, 128) f32

    def forward(self, x, *, out_dtype=jnp.float32):
        # out_dtype=jnp.bfloat16 halves output HBM writeback but diverges from
        # PyTorch's f32 output, so it is opt-in.
        out = fc1_forward(x, self._w1t_bf16, self._b1_2d, out_dtype=out_dtype)
        fc_w1 = [self.fc1_w, self.fc1_b]   # fc1.parameters(): weight, bias
        fc_w2 = [self.fc2_w]               # fc2.parameters(): weight only
        return (out, fc_w1, fc_w2)


if __name__ == "__main__":
    key = jax.random.PRNGKey(0)
    kparams, kx1, kx2 = jax.random.split(key, 3)

    model = PrototypeJAX(kparams)

    # ---- Small-shape smoke test (single grid step) ----
    B = 8
    x = jax.random.normal(kx1, (B, IN_FEATURES), jnp.float32)
    out, fc_w1, fc_w2 = model.forward(x)
    out = jax.block_until_ready(out)

    assert out.shape == (B, HIDDEN)
    assert out.dtype == jnp.float32
    assert fc_w1[0].shape == (HIDDEN, IN_FEATURES)
    assert fc_w1[1].shape == (HIDDEN,)
    assert fc_w2[0].shape == (OUT2, HIDDEN)

    # Tight check against a reference using the same bf16-input rounding.
    ref_bf16 = jnp.dot(x.astype(jnp.bfloat16), model._w1t_bf16,
                       preferred_element_type=jnp.float32) + model.fc1_b
    assert jnp.allclose(out, ref_bf16, atol=1e-3, rtol=1e-3)

    # Loose check against the pure-f32 PyTorch semantics (bf16 rounding only).
    ref_f32 = x @ model.fc1_w.T + model.fc1_b
    assert jnp.allclose(out, ref_f32, atol=5e-2, rtol=5e-2)

    # ---- Multi-step grid + padded last tile (B not a multiple of TB) ----
    B2 = 600
    x2 = jax.random.normal(kx2, (B2, IN_FEATURES), jnp.float32)
    out2 = jax.block_until_ready(model.forward(x2)[0])
    ref2 = jnp.dot(x2.astype(jnp.bfloat16), model._w1t_bf16,
                   preferred_element_type=jnp.float32) + model.fc1_b
    assert out2.shape == (B2, HIDDEN)
    assert jnp.allclose(out2, ref2, atol=1e-3, rtol=1e-3)

    print("KERNEL_OK")
</pallas_src>

<mosaic_0001>
module attributes {stable_mosaic.version = 11 : i64} {
  func.func @_linear_kernel(%arg0: i32, %arg1: memref<8x512xf32, #tpu.memory_space<vmem>>, %arg2: memref<512x128xbf16, #tpu.memory_space<vmem>>, %arg3: memref<1x128xf32, #tpu.memory_space<vmem>>, %arg4: memref<8x128xf32, #tpu.memory_space<vmem>>) attributes {dimension_semantics = [#tpu.dimension_semantics<parallel>], iteration_bounds = array<i64: 1>, scalar_prefetch = 0 : i64, scratch_operands = 0 : i64, tpu.core_type = #tpu.core_type<tc>, window_params = [{transform_indices = @transform_0, window_bounds = array<i64: 8, 512>}, {pipeline_mode = #tpu.pipeline_mode<synchronous>, transform_indices = @transform_1, window_bounds = array<i64: 512, 128>}, {pipeline_mode = #tpu.pipeline_mode<synchronous>, transform_indices = @transform_2, window_bounds = array<i64: 1, 128>}, {transform_indices = @transform_3, window_bounds = array<i64: 8, 128>}]} {
    %c0 = arith.constant 0 : index
    %c0_0 = arith.constant 0 : index
    %0 = vector.load %arg1[%c0, %c0_0] : memref<8x512xf32, #tpu.memory_space<vmem>>, vector<8x512xf32>
    %1 = arith.truncf %0 : vector<8x512xf32> to vector<8x512xbf16>
    %c0_1 = arith.constant 0 : index
    %c0_2 = arith.constant 0 : index
    %2 = vector.load %arg2[%c0_1, %c0_2] : memref<512x128xbf16, #tpu.memory_space<vmem>>, vector<512x128xbf16>
    %cst = arith.constant dense<0.000000e+00> : vector<8x128xf32>
    %3 = tpu.matmul %1, %2, %cst {dimension_numbers = #tpu.dot_dimension_numbers<[1], [0], [0], [1], [0, 0, 1, 1], [], []>} : vector<8x512xbf16>, vector<512x128xbf16>, vector<8x128xf32> -> vector<8x128xf32>
    %c0_3 = arith.constant 0 : index
    %c0_4 = arith.constant 0 : index
    %4 = vector.load %arg3[%c0_3, %c0_4] : memref<1x128xf32, #tpu.memory_space<vmem>>, vector<1x128xf32>
    %5 = vector.broadcast %4 : vector<1x128xf32> to vector<8x128xf32>
    %6 = arith.addf %3, %5 : vector<8x128xf32>
    %c0_5 = arith.constant 0 : index
    %c0_6 = arith.constant 0 : index
    %7 = vector.load %arg4[%c0_5, %c0_6] : memref<8x128xf32, #tpu.memory_space<vmem>>, vector<8x128xf32>
    tpu.vector_store %arg4[%c0_5, %c0_6], %6 {strides = array<i32>} : memref<8x128xf32, #tpu.memory_space<vmem>>, vector<8x128xf32>,
    return
  }
  func.func @transform_0(%arg0: i32) -> (i32, i32) {
    %c0_i32 = arith.constant 0 : i32
    %c0_i32_0 = arith.constant 0 : i32
    return %arg0, %c0_i32 : i32, i32
  }
  func.func @transform_1(%arg0: i32) -> (i32, i32) {
    %c0_i32 = arith.constant 0 : i32
    %c0_i32_0 = arith.constant 0 : i32
    %c0_i32_1 = arith.constant 0 : i32
    return %c0_i32, %c0_i32_0 : i32, i32
  }
  func.func @transform_2(%arg0: i32) -> (i32, i32) {
    %c0_i32 = arith.constant 0 : i32
    %c0_i32_0 = arith.constant 0 : i32
    %c0_i32_1 = arith.constant 0 : i32
    return %c0_i32, %c0_i32_0 : i32, i32
  }
  func.func @transform_3(%arg0: i32) -> (i32, i32) {
    %c0_i32 = arith.constant 0 : i32
    %c0_i32_0 = arith.constant 0 : i32
    return %arg0, %c0_i32 : i32, i32
  }
}

</mosaic_0001>

<bundles_post_ra>
// kernel: fc1_forward.1
= control target key start
LH: loop header
LB: loop body
LE: loop exit
PB: predicated region body
PF: predicated region fallthrough
CT: control target
= control target key end

     0   :  { %8 = vsyncpa [#allocation3], 0  ;;  %s665_s0 = inlined_call_operand.hbm [shape: f32[8,512], index: 0, kind: input, shape index: {}]   ;;  %s666_s1 = inlined_call_operand.hbm [shape: bf16[512,128], index: 1, kind: input, shape index: {}]   ;;  %s667_s2 = inlined_call_operand.vmem [shape: f32[1,128], index: 2, kind: input, shape index: {}]   ;;  %s668_s3 = inlined_call_operand.hbm [shape: f32[8,128], index: 3, kind: output, shape index: {}]  }
   0x1   :  { %9 = vsyncpa [#allocation6], 0 }
   0x2   :  { %10 = vsyncpa [#allocation4], 0  ;;  %s16_s14 = sshll.u32 %s665_s0, 4  ;;  %s628_s15 = smov [#allocation2]   ;;  %s17_s14 = int_to_ptr.hbm [resolvable:$true] %s16_s14 }
   0x3   :  { %s18_s16 = sshll.u32 %s628_s15, 4  ;;  %s26_s19 = sshll.u32 %s666_s1, 4  ;;  %s19_s16 = int_to_ptr.vmem [resolvable:$true] %s18_s16  ;;  %s27_s19 = int_to_ptr.hbm [resolvable:$true] %s26_s19 }
   0x4   :  { %21 = dma.hbm_to_vmem [thread:$0]  %s17_s14, 512, %s19_s16, [#allocation3]  }
   0x5   :  { %s629_s20 = smov [#allocation5]   ;;  %s630_s22 = smov 64  }
   0x6   :  { %s28_s21 = sshll.u32 %s629_s20, 4  ;;  %s631_s23 = smov 4   ;;  %s29_s21 = int_to_ptr.vmem [resolvable:$true] %s28_s21 }
   0x7   :  { %34 = dma.hbm_to_vmem [thread:$0]  %s27_s19, 4096, %s29_s21, [#allocation6], %s630_s22, %s630_s22, %s631_s23  }
   0x8   :  { %622 = dma.done.wait [#allocation3], 512  }
   0x9   :  { %623 = vsyncadd [#allocation3], 4294966784 }
   0xa   :  { %624 = dma.done.wait [#allocation6], 4096  }
   0xb   :  { %625 = vsyncadd [#allocation6], 4294963200  ;;  %v519_v0 = vld [vmem:[#allocation5 + $0x38] sm:$0xff]  ;;  %v518_v4 = vld [vmem:[#allocation5 + $0x30] sm:$0xff]  ;;  %s632_s24 = smov [#allocation7]   ;;  %s373_s28 = sshll.u32 %s668_s3, 4  ;;  %s374_s28 = int_to_ptr.hbm [resolvable:$true] %s373_s28 }
   0xc   :  { %v527_v1 = vld [vmem:[#allocation5 + $0x78] sm:$0xff]  ;;  %313 = vmatpush.bf16.msra.mxu0 %v519_v0  ;;  %v526_v5 = vld [vmem:[#allocation5 + $0x70] sm:$0xff]  ;;  %v517_v8 = vld [vmem:[#allocation5 + $0x28] sm:$0xff]  ;;  %s371_s25 = sshll.u32 %s632_s24, 4  ;;  %s372_s25 = int_to_ptr.vmem [resolvable:$true] %s371_s25 }
   0xd   :  { %v535_v2 = vld [vmem:[#allocation5 + $0xb8] sm:$0xff]  ;;  %326 = vmatpush.bf16.msra.mxu1 %v527_v1  ;;  %v534_v6 = vld [vmem:[#allocation5 + $0xb0] sm:$0xff]  ;;  %v525_v9 = vld [vmem:[#allocation5 + $0x68] sm:$0xff] }
   0xe   :  { %v543_v3 = vld [vmem:[#allocation5 + $0xf8] sm:$0xff]  ;;  %339 = vmatpush.bf16.msra.mxu2 %v535_v2  ;;  %v542_v7 = vld [vmem:[#allocation5 + $0xf0] sm:$0xff]  ;;  %v533_v10 = vld [vmem:[#allocation5 + $0xa8] sm:$0xff] }
   0xf   :  { %352 = vmatpush.bf16.msra.mxu3 %v543_v3  ;;  %v541_v11 = vld [vmem:[#allocation5 + $0xe8] sm:$0xff]  ;;  %v516_v12 = vld [vmem:[#allocation5 + $0x20] sm:$0xff]  ;;  %v515_v16 = vld [vmem:[#allocation5 + $0x18] sm:$0xff] }
  0x10   :  { %314 = vmatpush.bf16.msra.mxu0 %v518_v4  ;;  %v524_v13 = vld [vmem:[#allocation5 + $0x60] sm:$0xff]  ;;  %v523_v17 = vld [vmem:[#allocation5 + $0x58] sm:$0xff]  ;;  %v514_v20 = vld [vmem:[#allocation5 + $0x10] sm:$0xff] }
  0x11   :  { %327 = vmatpush.bf16.msra.mxu1 %v526_v5  ;;  %v532_v14 = vld [vmem:[#allocation5 + $0xa0] sm:$0xff]  ;;  %v531_v18 = vld [vmem:[#allocation5 + $0x98] sm:$0xff]  ;;  %v522_v21 = vld [vmem:[#allocation5 + $0x50] sm:$0xff] }
  0x12   :  { %340 = vmatpush.bf16.msra.mxu2 %v534_v6  ;;  %v540_v15 = vld [vmem:[#allocation5 + $0xe0] sm:$0xff]  ;;  %v539_v19 = vld [vmem:[#allocation5 + $0xd8] sm:$0xff]  ;;  %v530_v22 = vld [vmem:[#allocation5 + $0x90] sm:$0xff] }
  0x13   :  { %353 = vmatpush.bf16.msra.mxu3 %v542_v7  ;;  %v538_v23 = vld [vmem:[#allocation5 + $0xd0] sm:$0xff]  ;;  %v513_v24 = vld [vmem:[#allocation5 + $0x8] sm:$0xff]  ;;  %v512_v28 = vld [vmem:[#allocation5] sm:$0xff] }
  0x14   :  { %315 = vmatpush.bf16.msra.mxu0 %v517_v8  ;;  %v521_v25 = vld [vmem:[#allocation5 + $0x48] sm:$0xff]  ;;  %v520_v29 = vld [vmem:[#allocation5 + $0x40] sm:$0xff]  ;;  %v47_v34 = vld [vmem:[#allocation2 + $0x10] sm:$0xff] }
  0x15   :  { %328 = vmatpush.bf16.msra.mxu1 %v525_v9  ;;  %v529_v26 = vld [vmem:[#allocation5 + $0x88] sm:$0xff]  ;;  %v528_v30 = vld [vmem:[#allocation5 + $0x80] sm:$0xff]  ;;  %v48_v35 = vld [vmem:[#allocation2 + $0x18] sm:$0xff]  ;;  %v51_v38 = vpack.c.bf16 %v47_v34, %v47_v34 }
  0x16   :  { %341 = vmatpush.bf16.msra.mxu2 %v533_v10  ;;  %v537_v27 = vld [vmem:[#allocation5 + $0xc8] sm:$0xff]  ;;  %v45_v31 = vld [vmem:[#allocation2] sm:$0xff]  ;;  %v52_v39 = vpack.c.bf16 %v48_v35, %v48_v35 }
  0x17   :  { %354 = vmatpush.bf16.msra.mxu3 %v541_v11  ;;  %v46_v32 = vld [vmem:[#allocation2 + $0x8] sm:$0xff]  ;;  %v536_v33 = vld [vmem:[#allocation5 + $0xc0] sm:$0xff]  ;;  %v49_v36 = vpack.c.bf16 %v45_v31, %v45_v31 }
  0x18   :  { %316 = vmatpush.bf16.msra.mxu0 %v516_v12  ;;  %v50_v37 = vpack.c.bf16 %v46_v32, %v46_v32  ;;  %v549_v40 = vld [vmem:[%s667_s2] ss:$0 sm:$0xff] }
  0x19   :  { %329 = vmatpush.bf16.msra.mxu1 %v524_v13 }
  0x1a   :  { %342 = vmatpush.bf16.msra.mxu2 %v532_v14 }
  0x1b   :  { %355 = vmatpush.bf16.msra.mxu3 %v540_v15 }
  0x1c   :  { %317 = vmatpush.bf16.msra.mxu0 %v515_v16 }
  0x1d   :  { %330 = vmatpush.bf16.msra.mxu1 %v523_v17 }
  0x1e   :  { %343 = vmatpush.bf16.msra.mxu2 %v531_v18 }
  0x1f   :  { %356 = vmatpush.bf16.msra.mxu3 %v539_v19 }
  0x20   :  { %318 = vmatpush.bf16.msra.mxu0 %v514_v20 }
  0x21   :  { %331 = vmatpush.bf16.msra.mxu1 %v522_v21 }
  0x22   :  { %344 = vmatpush.bf16.msra.mxu2 %v530_v22 }
  0x23   :  { %357 = vmatpush.bf16.msra.mxu3 %v538_v23 }
  0x24   :  { %319 = vmatpush.bf16.msra.mxu0 %v513_v24 }
  0x25   :  { %332 = vmatpush.bf16.msra.mxu1 %v521_v25 }
  0x26   :  { %345 = vmatpush.bf16.msra.mxu2 %v529_v26 }
  0x27   :  { %358 = vmatpush.bf16.msra.mxu3 %v537_v27 }
  0x28   :  { %320 = vmatpush.bf16.msra.mxu0 %v512_v28 }
  0x29   :  { %333 = vmatpush.bf16.msra.mxu1 %v520_v29 }
  0x2a   :  { %346 = vmatpush.bf16.msra.mxu2 %v528_v30 }
  0x2b   :  { %359 = vmatpush.bf16.msra.mxu3 %v536_v33  ;;  %321 = vmatmul.bf16.vlgmr.msra.gmra.mxu0 %v49_v36 }
  0x2c   :  { %334 = vmatmul.bf16.vlgmr.msra.gmra.mxu1 %v50_v37 }
  0x2d   :  { %347 = vmatmul.bf16.vlgmr.msra.gmra.mxu2 %v51_v38 }
  0x2e   :  { %360 = vmatmul.bf16.vlgmr.msra.gmra.mxu3 %v52_v39 }
  0xa8   :  { %v322_v41 = vpop.f32.mrf.mxu0 }
  0xa9   :  { %v335_v42 = vpop.f32.mrf.mxu1  ;;  %v323_v43 = vadd.f32 %v549_v40, %v322_v41 }
  0xab   :  { %v336_v44 = vadd.f32 %v335_v42, %v323_v43 }
  0xb0   :  { %v348_v45 = vpop.f32.mrf.mxu2  ;;  %v324_v48 = vpop.f32.mrf.mxu0 }
  0xb1   :  { %v361_v46 = vpop.f32.mrf.mxu3  ;;  %v349_v47 = vadd.f32 %v348_v45, %v336_v44  ;;  %v337_v49 = vpop.f32.mrf.mxu1 }
  0xb3   :  { %v362_v50 = vadd.f32 %v361_v46, %v349_v47 }
  0xb5   :  { %365 = vst [vmem:[#allocation7] sm:$0xff] %v362_v50 }
  0xb6   :  { %376 = dma.vmem_to_hbm [thread:$0]  %s372_s25, 128, %s374_s28, [#allocation4]  }
  0xb8   :  { %v350_v51 = vpop.f32.mrf.mxu2 }
  0xb9   :  { %v363_v52 = vpop.f32.mrf.mxu3 }
  0xba   :  { %626 = dma.done.wait [#allocation4], 128  }
  0xbb   :  { %627 = vsyncadd [#allocation4], 4294967168 }
  0xbc   :  { %381 = vsyncpa [#allocation3], 1 }
  0xbd   :  { %382 = vsyncpa [#allocation6], 1 }
  0xbe   :  { %383 = vsyncpa [#allocation4], 1 }

</bundles_post_ra>
